<compile_context>
chip_gen: v7x
topology: tpu7x:2x2x1
jax: 0.10.0
libtpu: 0.0.40
codegen_flags: <defaults>
</compile_context>

<pallas_src>
import math

import jax
import jax.numpy as jnp
from jax.experimental import pallas as pl
from jax.experimental.pallas import tpu as pltpu


_VMEM = pl.BlockSpec(memory_space=pltpu.MemorySpace.VMEM)
_OUT_PAD = 128  # lane-dense padding for the tiny (B, 2) fc output


# ----------------------------- fused Pallas kernel -----------------------------


def _make_fused_kernel(num_layers):
    """Builds a kernel that unrolls all GRU layers + the final Linear.

    Kernel ref layout:
      x_ref    : (B, I)        single time-step input
      hpre_ref : (L, B, H)     previous hidden states
      per layer l (4 refs each):
        wi_l   : (I_l, 3H)     packed [W_ir | W_iz | W_in]  (transposed vs torch)
        wh_l   : (H,  3H)      packed [W_hr | W_hz | W_hn]
        bi_l   : (1,  3H)      packed [b_ir | b_iz | b_in]
        bh_l   : (1,  3H)      packed [b_hr | b_hz | b_hn]
      fc_w     : (H, OUT_PAD)  Linear weight zero-padded beyond column 2
      fc_b     : (1, OUT_PAD)  Linear bias   zero-padded beyond column 2
      h_out_ref: (L, B, H)     new hidden states (output)
      fid_ref  : (B, OUT_PAD)  Linear output, lane-dense padded (output)
    """

    def kernel(x_ref, hpre_ref, *args):
        weight_refs = args[: 4 * num_layers]
        fc_w_ref, fc_b_ref, h_out_ref, fid_ref = args[4 * num_layers:]

        H = hpre_ref.shape[-1]
        layer_in = x_ref[...]

        for l in range(num_layers):  # unrolled Python loop over layers
            wi_ref, wh_ref, bi_ref, bh_ref = weight_refs[4 * l: 4 * l + 4]
            h = hpre_ref[l]  # (B, H)

            # Two packed matmuls (N = 3H) instead of six (N = H).
            gi = jnp.dot(layer_in, wi_ref[...],
                         preferred_element_type=jnp.float32) + bi_ref[...]
            gh = jnp.dot(h, wh_ref[...],
                         preferred_element_type=jnp.float32) + bh_ref[...]

            # PyTorch GRU gate equations; note r multiplies only the
            # hidden-side n pre-activation (which already contains bh_n).
            r = jax.nn.sigmoid(gi[:, :H] + gh[:, :H])
            z = jax.nn.sigmoid(gi[:, H:2 * H] + gh[:, H:2 * H])
            n = jnp.tanh(gi[:, 2 * H:] + r * gh[:, 2 * H:])
            h_new = (1.0 - z) * n + z * h

            h_out_ref[l] = h_new      # write directly into (L,B,H) output
            layer_in = h_new

        # TODO(synk): nn.Dropout(0.5) applied as identity (inference mode); a
        # training variant would use pltpu.prng_seed + pltpu.prng_random_bits.
        fid_ref[...] = (
            jnp.dot(layer_in, fc_w_ref[...], preferred_element_type=jnp.float32)
            + fc_b_ref[...]
        )

    return kernel


# --------------------------- parameter initialization ---------------------------


def init_params(key, hidden_num, layer_num, input_size=2, out_size=2):
    """Uniform(-1/sqrt(H), 1/sqrt(H)) init (PyTorch default), packed gate layout."""
    k = 1.0 / math.sqrt(hidden_num)
    params = {"wi": [], "wh": [], "bi": [], "bh": []}
    for l in range(layer_num):
        in_l = input_size if l == 0 else hidden_num
        key, k1, k2, k3, k4 = jax.random.split(key, 5)
        # packed along the output dim: columns = [r | z | n]
        params["wi"].append(
            jax.random.uniform(k1, (in_l, 3 * hidden_num), jnp.float32, -k, k))
        params["wh"].append(
            jax.random.uniform(k2, (hidden_num, 3 * hidden_num), jnp.float32, -k, k))
        params["bi"].append(
            jax.random.uniform(k3, (1, 3 * hidden_num), jnp.float32, -k, k))
        params["bh"].append(
            jax.random.uniform(k4, (1, 3 * hidden_num), jnp.float32, -k, k))
    key, k5, k6 = jax.random.split(key, 3)
    fc_w = jax.random.uniform(k5, (hidden_num, out_size), jnp.float32, -k, k)
    fc_b = jax.random.uniform(k6, (1, out_size), jnp.float32, -k, k)
    # Zero-pad fc to a lane-dense 128-wide output block.
    params["fc_w"] = jnp.pad(fc_w, ((0, 0), (0, _OUT_PAD - out_size)))
    params["fc_b"] = jnp.pad(fc_b, ((0, 0), (0, _OUT_PAD - out_size)))
    params["out_size"] = out_size
    return params


# --------------------------------- forward pass ---------------------------------


def rrnn_decoder_forward(params, inp, hidden_pre):
    """inp: (B, 1, 2) f32, hidden_pre: (L, B, H) f32 -> (fid (B,1,2), hidden (L,B,H))."""
    B, S, I = inp.shape
    assert S == 1, "decoder consumes a single time-step (out.squeeze(1))"
    L, _, H = hidden_pre.shape
    out_size = params["out_size"]

    x = inp.reshape(B, I)  # squeeze seq dim

    flat_weights = []
    for l in range(L):
        flat_weights += [params["wi"][l], params["wh"][l],
                         params["bi"][l], params["bh"][l]]

    num_inputs = 2 + len(flat_weights) + 2  # x, hidden_pre, per-layer weights, fc_w, fc_b

    # Single fused kernel: all layers + Linear in one launch, whole arrays in
    # VMEM (few tens of KB at these shapes; re-derive tiling / vmem_limit_bytes
    # before scaling H to thousands on v7x's 64 MiB VMEM).
    # TODO(synk): if the caller allows in-place hidden-state update (decode
    # loop), add input_output_aliases to alias hidden_pre with hidden_decoder.
    hidden_decoder, fid_pad = pl.pallas_call(
        _make_fused_kernel(L),
        out_shape=(
            jax.ShapeDtypeStruct((L, B, H), jnp.float32),
            jax.ShapeDtypeStruct((B, _OUT_PAD), jnp.float32),
        ),
        in_specs=[_VMEM] * num_inputs,
        out_specs=(_VMEM, _VMEM),
    )(x, hidden_pre, *flat_weights, params["fc_w"], params["fc_b"])

    fid = fid_pad[:, :out_size][:, None, :]  # (B, 1, 2)
    return fid, hidden_decoder


# -------------------------------- reference check --------------------------------


def _forward_ref(params, inp, hidden_pre):
    B, S, I = inp.shape
    L, _, H = hidden_pre.shape
    out_size = params["out_size"]
    layer_in = inp.reshape(B, I)
    new_hidden = []
    for l in range(L):
        h = hidden_pre[l]
        gi = layer_in @ params["wi"][l] + params["bi"][l]
        gh = h @ params["wh"][l] + params["bh"][l]
        r = jax.nn.sigmoid(gi[:, :H] + gh[:, :H])
        z = jax.nn.sigmoid(gi[:, H:2 * H] + gh[:, H:2 * H])
        n = jnp.tanh(gi[:, 2 * H:] + r * gh[:, 2 * H:])
        h_new = (1.0 - z) * n + z * h
        new_hidden.append(h_new)
        layer_in = h_new
    out = layer_in @ params["fc_w"][:, :out_size] + params["fc_b"][:, :out_size]
    return out[:, None, :], jnp.stack(new_hidden, axis=0)


# -------------------------------------- main --------------------------------------

if __name__ == "__main__":
    hiddenNum, layerNum = 32, 2
    batch = 2

    key = jax.random.PRNGKey(0)
    key, kp, kx, kh = jax.random.split(key, 4)

    params = init_params(kp, hiddenNum, layerNum)
    inp = jax.random.normal(kx, (batch, 1, 2), jnp.float32)            # (B, 1, 2)
    hidden_pre = jax.random.normal(kh, (layerNum, batch, hiddenNum),
                                   jnp.float32)                         # (L, B, H)

    fid, hidden_decoder = rrnn_decoder_forward(params, inp, hidden_pre)
    fid = jax.block_until_ready(fid)
    hidden_decoder = jax.block_until_ready(hidden_decoder)

    assert fid.shape == (batch, 1, 2)
    assert hidden_decoder.shape == (layerNum, batch, hiddenNum)

    fid_ref, hidden_ref = _forward_ref(params, inp, hidden_pre)
    assert jnp.allclose(fid, fid_ref, atol=1e-5, rtol=1e-5)
    assert jnp.allclose(hidden_decoder, hidden_ref, atol=1e-5, rtol=1e-5)

    print("KERNEL_OK")
</pallas_src>

<mosaic_0001>
module attributes {stable_mosaic.version = 11 : i64} {
  func.func @kernel(%arg0: memref<2x2xf32, #tpu.memory_space<vmem>>, %arg1: memref<2x2x32xf32, #tpu.memory_space<vmem>>, %arg2: memref<2x96xf32, #tpu.memory_space<vmem>>, %arg3: memref<32x96xf32, #tpu.memory_space<vmem>>, %arg4: memref<1x96xf32, #tpu.memory_space<vmem>>, %arg5: memref<1x96xf32, #tpu.memory_space<vmem>>, %arg6: memref<32x96xf32, #tpu.memory_space<vmem>>, %arg7: memref<32x96xf32, #tpu.memory_space<vmem>>, %arg8: memref<1x96xf32, #tpu.memory_space<vmem>>, %arg9: memref<1x96xf32, #tpu.memory_space<vmem>>, %arg10: memref<32x128xf32, #tpu.memory_space<vmem>>, %arg11: memref<1x128xf32, #tpu.memory_space<vmem>>, %arg12: memref<2x2x32xf32, #tpu.memory_space<vmem>>, %arg13: memref<2x128xf32, #tpu.memory_space<vmem>>) attributes {dimension_semantics = [], scalar_prefetch = 0 : i64, scratch_operands = 0 : i64, tpu.core_type = #tpu.core_type<tc>} {
    %c0 = arith.constant 0 : index
    %c0_0 = arith.constant 0 : index
    %0 = vector.load %arg0[%c0, %c0_0] : memref<2x2xf32, #tpu.memory_space<vmem>>, vector<2x2xf32>
    %c0_1 = arith.constant 0 : index
    %c0_2 = arith.constant 0 : index
    %c0_3 = arith.constant 0 : index
    %1 = vector.load %arg1[%c0_1, %c0_2, %c0_3] : memref<2x2x32xf32, #tpu.memory_space<vmem>>, vector<1x2x32xf32>
    %2 = vector.shape_cast %1 : vector<1x2x32xf32> to vector<2x32xf32>
    %c0_4 = arith.constant 0 : index
    %c0_5 = arith.constant 0 : index
    %3 = vector.load %arg2[%c0_4, %c0_5] : memref<2x96xf32, #tpu.memory_space<vmem>>, vector<2x96xf32>
    %cst = arith.constant dense<0.000000e+00> : vector<2x96xf32>
    %4 = tpu.matmul %0, %3, %cst {dimension_numbers = #tpu.dot_dimension_numbers<[1], [0], [0], [1], [0, 0, 1, 1], [], []>} : vector<2x2xf32>, vector<2x96xf32>, vector<2x96xf32> -> vector<2x96xf32>
    %c0_6 = arith.constant 0 : index
    %c0_7 = arith.constant 0 : index
    %5 = vector.load %arg4[%c0_6, %c0_7] : memref<1x96xf32, #tpu.memory_space<vmem>>, vector<1x96xf32>
    %6 = vector.broadcast %5 : vector<1x96xf32> to vector<2x96xf32>
    %7 = arith.addf %4, %6 : vector<2x96xf32>
    %c0_8 = arith.constant 0 : index
    %c0_9 = arith.constant 0 : index
    %8 = vector.load %arg3[%c0_8, %c0_9] : memref<32x96xf32, #tpu.memory_space<vmem>>, vector<32x96xf32>
    %cst_10 = arith.constant dense<0.000000e+00> : vector<2x96xf32>
    %9 = tpu.matmul %2, %8, %cst_10 {dimension_numbers = #tpu.dot_dimension_numbers<[1], [0], [0], [1], [0, 0, 1, 1], [], []>} : vector<2x32xf32>, vector<32x96xf32>, vector<2x96xf32> -> vector<2x96xf32>
    %c0_11 = arith.constant 0 : index
    %c0_12 = arith.constant 0 : index
    %10 = vector.load %arg5[%c0_11, %c0_12] : memref<1x96xf32, #tpu.memory_space<vmem>>, vector<1x96xf32>
    %11 = vector.broadcast %10 : vector<1x96xf32> to vector<2x96xf32>
    %12 = arith.addf %9, %11 : vector<2x96xf32>
    %13 = vector.extract_strided_slice %7 {offsets = [0, 0], sizes = [2, 32], strides = [1, 1]} : vector<2x96xf32> to vector<2x32xf32>
    %14 = vector.extract_strided_slice %12 {offsets = [0, 0], sizes = [2, 32], strides = [1, 1]} : vector<2x96xf32> to vector<2x32xf32>
    %15 = arith.addf %13, %14 : vector<2x32xf32>
    %16 = arith.negf %15 : vector<2x32xf32>
    %17 = math.exp %16 : vector<2x32xf32>
    %cst_13 = arith.constant 1.000000e+00 : f32
    %18 = vector.broadcast %cst_13 : f32 to vector<2x32xf32>
    %19 = arith.addf %18, %17 : vector<2x32xf32>
    %20 = arith.divf %18, %19 : vector<2x32xf32>
    %21 = vector.extract_strided_slice %7 {offsets = [0, 32], sizes = [2, 32], strides = [1, 1]} : vector<2x96xf32> to vector<2x32xf32>
    %22 = vector.extract_strided_slice %12 {offsets = [0, 32], sizes = [2, 32], strides = [1, 1]} : vector<2x96xf32> to vector<2x32xf32>
    %23 = arith.addf %21, %22 : vector<2x32xf32>
    %24 = arith.negf %23 : vector<2x32xf32>
    %25 = math.exp %24 : vector<2x32xf32>
    %cst_14 = arith.constant 1.000000e+00 : f32
    %26 = vector.broadcast %cst_14 : f32 to vector<2x32xf32>
    %27 = arith.addf %26, %25 : vector<2x32xf32>
    %28 = arith.divf %26, %27 : vector<2x32xf32>
    %29 = vector.extract_strided_slice %7 {offsets = [0, 64], sizes = [2, 32], strides = [1, 1]} : vector<2x96xf32> to vector<2x32xf32>
    %30 = vector.extract_strided_slice %12 {offsets = [0, 64], sizes = [2, 32], strides = [1, 1]} : vector<2x96xf32> to vector<2x32xf32>
    %31 = arith.mulf %20, %30 : vector<2x32xf32>
    %32 = arith.addf %29, %31 : vector<2x32xf32>
    %33 = math.tanh %32 : vector<2x32xf32>
    %cst_15 = arith.constant 1.000000e+00 : f32
    %34 = vector.broadcast %cst_15 : f32 to vector<2x32xf32>
    %35 = arith.subf %34, %28 : vector<2x32xf32>
    %36 = arith.mulf %35, %33 : vector<2x32xf32>
    %37 = arith.mulf %28, %2 : vector<2x32xf32>
    %38 = arith.addf %36, %37 : vector<2x32xf32>
    %c0_16 = arith.constant 0 : index
    %c0_17 = arith.constant 0 : index
    %c0_18 = arith.constant 0 : index
    %39 = vector.load %arg12[%c0_16, %c0_17, %c0_18] : memref<2x2x32xf32, #tpu.memory_space<vmem>>, vector<1x2x32xf32>
    %40 = vector.shape_cast %39 : vector<1x2x32xf32> to vector<2x32xf32>
    %41 = vector.shape_cast %38 : vector<2x32xf32> to vector<1x2x32xf32>
    tpu.vector_store %arg12[%c0_16, %c0_17, %c0_18], %41 {strides = array<i32>} : memref<2x2x32xf32, #tpu.memory_space<vmem>>, vector<1x2x32xf32>,
    %c1 = arith.constant 1 : index
    %c0_19 = arith.constant 0 : index
    %c0_20 = arith.constant 0 : index
    %42 = vector.load %arg1[%c1, %c0_19, %c0_20] : memref<2x2x32xf32, #tpu.memory_space<vmem>>, vector<1x2x32xf32>
    %43 = vector.shape_cast %42 : vector<1x2x32xf32> to vector<2x32xf32>
    %c0_21 = arith.constant 0 : index
    %c0_22 = arith.constant 0 : index
    %44 = vector.load %arg6[%c0_21, %c0_22] : memref<32x96xf32, #tpu.memory_space<vmem>>, vector<32x96xf32>
    %cst_23 = arith.constant dense<0.000000e+00> : vector<2x96xf32>
    %45 = tpu.matmul %38, %44, %cst_23 {dimension_numbers = #tpu.dot_dimension_numbers<[1], [0], [0], [1], [0, 0, 1, 1], [], []>} : vector<2x32xf32>, vector<32x96xf32>, vector<2x96xf32> -> vector<2x96xf32>
    %c0_24 = arith.constant 0 : index
    %c0_25 = arith.constant 0 : index
    %46 = vector.load %arg8[%c0_24, %c0_25] : memref<1x96xf32, #tpu.memory_space<vmem>>, vector<1x96xf32>
    %47 = vector.broadcast %46 : vector<1x96xf32> to vector<2x96xf32>
    %48 = arith.addf %45, %47 : vector<2x96xf32>
    %c0_26 = arith.constant 0 : index
    %c0_27 = arith.constant 0 : index
    %49 = vector.load %arg7[%c0_26, %c0_27] : memref<32x96xf32, #tpu.memory_space<vmem>>, vector<32x96xf32>
    %cst_28 = arith.constant dense<0.000000e+00> : vector<2x96xf32>
    %50 = tpu.matmul %43, %49, %cst_28 {dimension_numbers = #tpu.dot_dimension_numbers<[1], [0], [0], [1], [0, 0, 1, 1], [], []>} : vector<2x32xf32>, vector<32x96xf32>, vector<2x96xf32> -> vector<2x96xf32>
    %c0_29 = arith.constant 0 : index
    %c0_30 = arith.constant 0 : index
    %51 = vector.load %arg9[%c0_29, %c0_30] : memref<1x96xf32, #tpu.memory_space<vmem>>, vector<1x96xf32>
    %52 = vector.broadcast %51 : vector<1x96xf32> to vector<2x96xf32>
    %53 = arith.addf %50, %52 : vector<2x96xf32>
    %54 = vector.extract_strided_slice %48 {offsets = [0, 0], sizes = [2, 32], strides = [1, 1]} : vector<2x96xf32> to vector<2x32xf32>
    %55 = vector.extract_strided_slice %53 {offsets = [0, 0], sizes = [2, 32], strides = [1, 1]} : vector<2x96xf32> to vector<2x32xf32>
    %56 = arith.addf %54, %55 : vector<2x32xf32>
    %57 = arith.negf %56 : vector<2x32xf32>
    %58 = math.exp %57 : vector<2x32xf32>
    %cst_31 = arith.constant 1.000000e+00 : f32
    %59 = vector.broadcast %cst_31 : f32 to vector<2x32xf32>
    %60 = arith.addf %59, %58 : vector<2x32xf32>
    %61 = arith.divf %59, %60 : vector<2x32xf32>
    %62 = vector.extract_strided_slice %48 {offsets = [0, 32], sizes = [2, 32], strides = [1, 1]} : vector<2x96xf32> to vector<2x32xf32>
    %63 = vector.extract_strided_slice %53 {offsets = [0, 32], sizes = [2, 32], strides = [1, 1]} : vector<2x96xf32> to vector<2x32xf32>
    %64 = arith.addf %62, %63 : vector<2x32xf32>
    %65 = arith.negf %64 : vector<2x32xf32>
    %66 = math.exp %65 : vector<2x32xf32>
    %cst_32 = arith.constant 1.000000e+00 : f32
    %67 = vector.broadcast %cst_32 : f32 to vector<2x32xf32>
    %68 = arith.addf %67, %66 : vector<2x32xf32>
    %69 = arith.divf %67, %68 : vector<2x32xf32>
    %70 = vector.extract_strided_slice %48 {offsets = [0, 64], sizes = [2, 32], strides = [1, 1]} : vector<2x96xf32> to vector<2x32xf32>
    %71 = vector.extract_strided_slice %53 {offsets = [0, 64], sizes = [2, 32], strides = [1, 1]} : vector<2x96xf32> to vector<2x32xf32>
    %72 = arith.mulf %61, %71 : vector<2x32xf32>
    %73 = arith.addf %70, %72 : vector<2x32xf32>
    %74 = math.tanh %73 : vector<2x32xf32>
    %cst_33 = arith.constant 1.000000e+00 : f32
    %75 = vector.broadcast %cst_33 : f32 to vector<2x32xf32>
    %76 = arith.subf %75, %69 : vector<2x32xf32>
    %77 = arith.mulf %76, %74 : vector<2x32xf32>
    %78 = arith.mulf %69, %43 : vector<2x32xf32>
    %79 = arith.addf %77, %78 : vector<2x32xf32>
    %c1_34 = arith.constant 1 : index
    %c0_35 = arith.constant 0 : index
    %c0_36 = arith.constant 0 : index
    %80 = vector.load %arg12[%c1_34, %c0_35, %c0_36] : memref<2x2x32xf32, #tpu.memory_space<vmem>>, vector<1x2x32xf32>
    %81 = vector.shape_cast %80 : vector<1x2x32xf32> to vector<2x32xf32>
    %82 = vector.shape_cast %79 : vector<2x32xf32> to vector<1x2x32xf32>
    tpu.vector_store %arg12[%c1_34, %c0_35, %c0_36], %82 {strides = array<i32>} : memref<2x2x32xf32, #tpu.memory_space<vmem>>, vector<1x2x32xf32>,
    %c0_37 = arith.constant 0 : index
    %c0_38 = arith.constant 0 : index
    %83 = vector.load %arg10[%c0_37, %c0_38] : memref<32x128xf32, #tpu.memory_space<vmem>>, vector<32x128xf32>
    %cst_39 = arith.constant dense<0.000000e+00> : vector<2x128xf32>
    %84 = tpu.matmul %79, %83, %cst_39 {dimension_numbers = #tpu.dot_dimension_numbers<[1], [0], [0], [1], [0, 0, 1, 1], [], []>} : vector<2x32xf32>, vector<32x128xf32>, vector<2x128xf32> -> vector<2x128xf32>
    %c0_40 = arith.constant 0 : index
    %c0_41 = arith.constant 0 : index
    %85 = vector.load %arg11[%c0_40, %c0_41] : memref<1x128xf32, #tpu.memory_space<vmem>>, vector<1x128xf32>
    %86 = vector.broadcast %85 : vector<1x128xf32> to vector<2x128xf32>
    %87 = arith.addf %84, %86 : vector<2x128xf32>
    %c0_42 = arith.constant 0 : index
    %c0_43 = arith.constant 0 : index
    %88 = vector.load %arg13[%c0_42, %c0_43] : memref<2x128xf32, #tpu.memory_space<vmem>>, vector<2x128xf32>
    tpu.vector_store %arg13[%c0_42, %c0_43], %87 {strides = array<i32>} : memref<2x128xf32, #tpu.memory_space<vmem>>, vector<2x128xf32>,
    return
  }
}

</mosaic_0001>

<bundles_post_ra>
// kernel: tpu_custom_call.1
= control target key start
LH: loop header
LB: loop body
LE: loop exit
PB: predicated region body
PF: predicated region fallthrough
CT: control target
= control target key end

     0   :  { %19 = vsyncpa [#allocation3], 0  ;;  %s1238_s0 = inlined_call_operand.hbm [shape: f32[2,2], index: 0, kind: input, shape index: {}]   ;;  %s1239_s1 = inlined_call_operand.hbm [shape: f32[2,2,32], index: 1, kind: input, shape index: {}]   ;;  %s1240_s2 = inlined_call_operand.vmem [shape: f32[2,96], index: 2, kind: input, shape index: {}]   ;;  %s1241_s3 = inlined_call_operand.hbm [shape: f32[32,96], index: 3, kind: input, shape index: {}]   ;;  %s1242_s4 = inlined_call_operand.vmem [shape: f32[1,96], index: 4, kind: input, shape index: {}]   ;;  %s1243_s5 = inlined_call_operand.vmem [shape: f32[1,96], index: 5, kind: input, shape index: {}]   ;;  %s1244_s6 = inlined_call_operand.hbm [shape: f32[32,96], index: 6, kind: input, shape index: {}]   ;;  %s1245_s7 = inlined_call_operand.hbm [shape: f32[32,96], index: 7, kind: input, shape index: {}]   ;;  %s1246_s8 = inlined_call_operand.vmem [shape: f32[1,96], index: 8, kind: input, shape index: {}]   ;;  %s1247_s9 = inlined_call_operand.hbm [shape: f32[1,96], index: 9, kind: input, shape index: {}]   ;;  %s1248_s10 = inlined_call_operand.vmem [shape: f32[32,128], index: 10, kind: input, shape index: {}]   ;;  %s1249_s11 = inlined_call_operand.vmem [shape: f32[1,128], index: 11, kind: input, shape index: {}]   ;;  %s1250_s12 = inlined_call_operand.hbm [shape: f32[2,2,32], index: 12, kind: output, shape index: {0}]   ;;  %s1251_s13 = inlined_call_operand.hbm [shape: f32[2,128], index: 13, kind: output, shape index: {1}]  }
   0x1   :  { %20 = vsyncpa [#allocation6], 0 }
   0x2   :  { %21 = vsyncpa [#allocation9], 0 }
   0x3   :  { %22 = vsyncpa [#allocation12], 0 }
   0x4   :  { %23 = vsyncpa [#allocation4], 0 }
   0x5   :  { %24 = vsyncpa [#allocation15], 0  ;;  %s978_s25 = smov [#allocation5]   ;;  %s790_s29 = scalar_lea.hbm %s1239_s1, 64 }
   0x6   :  { %s40_s26 = sshll.u32 %s978_s25, 4  ;;  %p791_p0 = scmp.ne.s32.totalorder %s1239_s1, %s790_s29  ;;  %s41_s26 = int_to_ptr.vmem [resolvable:$true] %s40_s26 }
   0x7   :  { %p794_p1 = scmp.lt.u32.totalorder %s790_s29, %s1239_s1 }
   0x9   :  { %p796_p2 = pnand %p794_p1, %p791_p0 }
   0xb   :  { %799 = shalt.err (!%p796_p2)
}
   0xc   :  { %s800_s17 = scalar_lea.vmem %s41_s26, 64  ;;  %p805_p4 = scmp.lt.s32.totalorder %s41_s26, %s41_s26 }
   0xd   :  { %p801_p3 = scmp.ne.s32.totalorder %s41_s26, %s800_s17  ;;  %p806_p5 = scmp.lt.s32.totalorder %s800_s17, %s800_s17 }
   0xf   :  { %p807_p6 = por %p806_p5, %p805_p4 }
  0x11   :  { %p808_p7 = pnand %p807_p6, %p801_p3 }
  0x13   :  { %811 = shalt.err (!%p808_p7)
}
  0x14   :  { %s979_s18 = smov 32   ;;  %s980_s19 = smov 2  }
  0x15   :  { %46 = dma.hbm_to_vmem [thread:$0]  %s1239_s1, 64, %s41_s26, [#allocation6], %s979_s18, %s979_s18, %s980_s19  }
  0x16   :  { %s981_s22 = smov [#allocation8]   ;;  %s982_s24 = smov [#allocation2]  }
  0x17   :  { %s70_s23 = sshll.u32 %s981_s22, 4  ;;  %s31_s25 = sshll.u32 %s982_s24, 4  ;;  %s71_s23 = int_to_ptr.vmem [resolvable:$true] %s70_s23  ;;  %s32_s25 = int_to_ptr.vmem [resolvable:$true] %s31_s25 }
  0x18   :  { %s812_s29 = scalar_lea.hbm %s1244_s6, 512 }
  0x19   :  { %p813_p8 = scmp.ne.s32.totalorder %s1244_s6, %s812_s29  ;;  %p816_p9 = scmp.lt.u32.totalorder %s812_s29, %s1244_s6 }
  0x1b   :  { %p818_p10 = pnand %p816_p9, %p813_p8 }
  0x1d   :  { %821 = shalt.err (!%p818_p10)
}
  0x1e   :  { %s822_s1 = scalar_lea.vmem %s71_s23, 512  ;;  %p827_p12 = scmp.lt.s32.totalorder %s71_s23, %s71_s23 }
  0x1f   :  { %p823_p11 = scmp.ne.s32.totalorder %s71_s23, %s822_s1  ;;  %p828_p13 = scmp.lt.s32.totalorder %s822_s1, %s822_s1 }
  0x21   :  { %p829_p0 = por %p828_p13, %p827_p12 }
  0x23   :  { %p830_p1 = pnand %p829_p0, %p823_p11 }
  0x25   :  { %833 = shalt.err (!%p830_p1)
}
  0x26   :  { %s983_s26 = smov 128   ;;  %s984_s17 = smov 8  }
  0x27   :  { %76 = dma.hbm_to_vmem [thread:$0]  %s1244_s6, 512, %s71_s23, [#allocation9], %s983_s26, %s983_s26, %s984_s17  }
  0x28   :  { %s834_s27 = scalar_lea.hbm %s1238_s0, 32 }
  0x29   :  { %p835_p2 = scmp.ne.s32.totalorder %s1238_s0, %s834_s27  ;;  %p838_p3 = scmp.lt.u32.totalorder %s834_s27, %s1238_s0 }
  0x2b   :  { %p840_p4 = pnand %p838_p3, %p835_p2 }
  0x2d   :  { %843 = shalt.err (!%p840_p4)
}
  0x2e   :  { %s844_s15 = scalar_lea.vmem %s32_s25, 32  ;;  %p849_p6 = scmp.lt.s32.totalorder %s32_s25, %s32_s25 }
  0x2f   :  { %p845_p5 = scmp.ne.s32.totalorder %s32_s25, %s844_s15  ;;  %p850_p7 = scmp.lt.s32.totalorder %s844_s15, %s844_s15 }
  0x31   :  { %p851_p8 = por %p850_p7, %p849_p6 }
  0x33   :  { %p852_p9 = pnand %p851_p8, %p845_p5 }
  0x35   :  { %855 = shalt.err (!%p852_p9)
}
  0x36   :  { %34 = dma.hbm_to_vmem [thread:$0]  %s1238_s0, 32, %s32_s25, [#allocation3]  }
  0x37   :  { %s985_s16 = smov [#allocation7]   ;;  %s986_s20 = smov [#allocation10]  }
  0x38   :  { %s54_s1 = sshll.u32 %s985_s16, 4  ;;  %s82_s21 = sshll.u32 %s986_s20, 4  ;;  %s55_s1 = int_to_ptr.vmem [resolvable:$true] %s54_s1  ;;  %s83_s21 = int_to_ptr.vmem [resolvable:$true] %s82_s21 }
  0x39   :  { %s856_s27 = scalar_lea.hbm %s1241_s3, 512 }
  0x3a   :  { %p857_p10 = scmp.ne.s32.totalorder %s1241_s3, %s856_s27  ;;  %p860_p11 = scmp.lt.u32.totalorder %s856_s27, %s1241_s3 }
  0x3c   :  { %p862_p12 = pnand %p860_p11, %p857_p10 }
  0x3e   :  { %865 = shalt.err (!%p862_p12)
}
  0x3f   :  { %s866_s0 = scalar_lea.vmem %s55_s1, 512  ;;  %p871_p0 = scmp.lt.s32.totalorder %s55_s1, %s55_s1 }
  0x40   :  { %p867_p13 = scmp.ne.s32.totalorder %s55_s1, %s866_s0  ;;  %p872_p1 = scmp.lt.s32.totalorder %s866_s0, %s866_s0 }
  0x42   :  { %p873_p2 = por %p872_p1, %p871_p0 }
  0x44   :  { %p874_p3 = pnand %p873_p2, %p867_p13 }
  0x46   :  { %877 = shalt.err (!%p874_p3)
}
  0x47   :  { %60 = dma.hbm_to_vmem [thread:$0]  %s1241_s3, 512, %s55_s1, [#allocation6], %s983_s26, %s983_s26, %s984_s17  }
  0x48   :  { %s878_s16 = scalar_lea.hbm %s1245_s7, 512 }
  0x49   :  { %p879_p4 = scmp.ne.s32.totalorder %s1245_s7, %s878_s16  ;;  %p882_p5 = scmp.lt.u32.totalorder %s878_s16, %s1245_s7 }
  0x4b   :  { %p884_p6 = pnand %p882_p5, %p879_p4 }
  0x4d   :  { %887 = shalt.err (!%p884_p6)
}
  0x4e   :  { %s888_s28 = scalar_lea.vmem %s83_s21, 512  ;;  %p893_p8 = scmp.lt.s32.totalorder %s83_s21, %s83_s21 }
  0x4f   :  { %p889_p7 = scmp.ne.s32.totalorder %s83_s21, %s888_s28  ;;  %p894_p9 = scmp.lt.s32.totalorder %s888_s28, %s888_s28 }
  0x51   :  { %p895_p10 = por %p894_p9, %p893_p8 }
  0x53   :  { %p896_p11 = pnand %p895_p10, %p889_p7 }
  0x55   :  { %899 = shalt.err (!%p896_p11)
}
  0x56   :  { %88 = dma.hbm_to_vmem [thread:$0]  %s1245_s7, 512, %s83_s21, [#allocation9], %s983_s26, %s983_s26, %s984_s17  }
  0x57   :  { %s987_s29 = smov [#allocation11]   ;;  %s900_s25 = scalar_lea.hbm %s1247_s9, 16 }
  0x58   :  { %s97_s30 = sshll.u32 %s987_s29, 4  ;;  %p901_p12 = scmp.ne.s32.totalorder %s1247_s9, %s900_s25  ;;  %s98_s30 = int_to_ptr.vmem [resolvable:$true] %s97_s30 }
  0x59   :  { %p904_p13 = scmp.lt.u32.totalorder %s900_s25, %s1247_s9 }
  0x5b   :  { %p906_p0 = pnand %p904_p13, %p901_p12 }
  0x5d   :  { %909 = shalt.err (!%p906_p0)
}
  0x5e   :  { %s910_s20 = scalar_lea.vmem %s98_s30, 16  ;;  %s914_s7 = scalar_lea.vmem %s98_s30, 32 }
  0x5f   :  { %p911_p1 = scmp.ne.s32.totalorder %s98_s30, %s910_s20  ;;  %p915_p2 = scmp.lt.s32.totalorder %s98_s30, %s98_s30 }
  0x60   :  { %p916_p3 = scmp.lt.s32.totalorder %s914_s7, %s910_s20 }
  0x62   :  { %p917_p4 = por %p916_p3, %p915_p2 }
  0x64   :  { %p918_p5 = pnand %p917_p4, %p911_p1 }
  0x66   :  { %921 = shalt.err (!%p918_p5)
}
  0x67   :  { %100 = dma.hbm_to_vmem [thread:$0]  %s1247_s9, 16, %s98_s30, [#allocation12]  }
  0x68   :  { %966 = dma.done.wait [#allocation3], 32  }
  0x69   :  { %967 = vsyncadd [#allocation3], 4294967264 }
  0x6a   :  { %968 = dma.done.wait [#allocation6], 576  }
  0x6b   :  { %969 = vsyncadd [#allocation6], 4294966720 }
  0x6c   :  { %970 = dma.done.wait [#allocation9], 1024  }
  0x6d   :  { %971 = vsyncadd [#allocation9], 4294966272 }
  0x6e   :  { %972 = dma.done.wait [#allocation12], 16  }
  0x6f   :  { %973 = vsyncadd [#allocation12], 4294967280  ;;  %v988_v0 = vmov 0.0|0.0   ;;  %v989_v1 = vmov 0.0   ;;  %vm990_vm0 = vmmov 0   ;;  %vm137_vm1 = vcmask 1041408  }
  0x70   :  { %737 = vmatprep.subr.bf16.mxu1 %v988_v0  ;;  %688 = vmatprep.subr.mxu0 %v989_v1  ;;  %v211_v2 = vld [vmem:[#allocation7] sm:$0xff]  ;;  %v212_v3 = vld [vmem:[#allocation7 + $0x8] sm:$0xff]  ;;  %v213_v4 = vld [vmem:[#allocation7 + $0x10] sm:$0xff]  ;;  %vm133_vm2 = vcmask 15360   ;;  %vm222_vm3 = vcmask 261120   ;;  %s991_s24 = smov 64  }
  0x71   :  { %690 = vmatprep.mubr.msk.f32.mxu0 %vm990_vm0, %v989_v1  ;;  %701 = vmatprep.mubr.msk.f32.mxu1 %vm990_vm0, %v989_v1  ;;  %v738_v5 = vpack.c.bf16 %v212_v3, %v211_v2  ;;  %v214_v6 = vld [vmem:[#allocation7 + $0x18] sm:$0xff]  ;;  %v416_v28 = vld [vmem:[#allocation10] sm:$0xff]  ;;  %v417_v29 = vld [vmem:[#allocation10 + $0x8] sm:$0xff]  ;;  %vm329_vm4 = vcmask 254976  }
  0x72   :  { %v125_v7 = vld [vmem:[%s1240_s2] sm:$0x3]  ;;  %v741_v9 = vpack.c.bf16 %v214_v6, %v213_v4  ;;  %v124_v10 = vld [vmem:[#allocation5] sm:$0x3]  ;;  %v418_v30 = vld [vmem:[#allocation10 + $0x10] sm:$0xff]  ;;  %v750_v31 = vpack.c.bf16 %v417_v29, %v416_v28 }
  0x73   :  { %v123_v8 = vld [vmem:[#allocation2] sm:$0x3]  ;;  %689 = vmatpush3.msk.msra.mxu0 %vm137_vm1, %v125_v7  ;;  %739 = vmatpush3.bf16.msra.mxu1 %v738_v5  ;;  %v333_v33 = vld [vmem:[#allocation8] sm:$0xff]  ;;  %v334_v34 = vld [vmem:[#allocation8 + $0x8] sm:$0xff] }
  0x74   :  { %691 = vmatmul.mubr.msk.f32.vlgmr.msra.gmra.mrb[0].mxu0 %vm133_vm2, %v123_v8  ;;  %740 = vmatprep.subr.bf16.mxu1 %v988_v0  ;;  %v656_v13 = vld [vmem:[%s1243_s5] ss:$0 sm:$0xff]  ;;  %v335_v35 = vld [vmem:[#allocation8 + $0x10] sm:$0xff]  ;;  %v744_v38 = vpack.c.bf16 %v334_v34, %v333_v33  ;;  %v332_v41 = vld [vmem:[#allocation5 + $0x2] sm:$0x3] }
  0x75   :  { %743 = vmatprep.subr.bf16.mxu0 %v988_v0  ;;  %712 = vmatprep.mubr.msk.f32.mxu0 %vm990_vm0, %v989_v1  ;;  %v653_v17 = vld [vmem:[%s1242_s4] ss:$0 sm:$0xff]  ;;  %s992_s4 = smov 96   ;;  %v661_v48 = vld [vmem:[#allocation11] ss:$0 sm:$0xff]  ;;  %v536_v4 = vld [vmem:[%s1248_s10 + $0x8] sm:$0xff] }
  0x76   :  { %v419_v32 = vld [vmem:[#allocation10 + $0x18] sm:$0xff]  ;;  %745 = vmatpush3.bf16.msra.mxu0 %v744_v38  ;;  %v537_v5 = vld [vmem:[%s1248_s10 + $0x10] sm:$0xff] }
  0x77   :  { %742 = vmatpush3.bf16.msra.mxu1 %v741_v9  ;;  %v336_v36 = vld [vmem:[#allocation8 + $0x18] sm:$0xff]  ;;  %v753_v37 = vpack.c.bf16 %v419_v32, %v418_v30  ;;  %746 = vmatprep.subr.bf16.mxu0 %v988_v0 }
  0x78   :  { %749 = vmatprep.subr.bf16.mxu1 %v988_v0  ;;  %v747_v40 = vpack.c.bf16 %v336_v36, %v335_v35  ;;  %v659_v53 = vld [vmem:[%s1246_s8] ss:$0 sm:$0xff]  ;;  %v538_v7 = vld [vmem:[%s1248_s10 + $0x18] sm:$0xff] }
  0x79   :  { %v535_v3 = vld [vmem:[%s1248_s10] sm:$0xff]  ;;  %v759_v8 = vpack.c.bf16 %v538_v7, %v537_v5  ;;  %s993_s10 = smov [#allocation13]  }
  0x7a   :  { %702 = vmatmul.mubr.msk.f32.vlgmr.msra.gmra.mrb[0].mxu1 %vm222_vm3, %v124_v10  ;;  %748 = vmatpush3.bf16.msra.mxu0 %v747_v40  ;;  %v756_v6 = vpack.c.bf16 %v536_v4, %v535_v3  ;;  %s624_s6 = sshll.u32 %s993_s10, 4  ;;  %s625_s6 = int_to_ptr.vmem [resolvable:$true] %s624_s6 }
  0x7b   :  { %723 = vmatprep.mubr.msk.f32.mxu1 %vm990_vm0, %v989_v1  ;;  %751 = vmatpush3.bf16.msra.mxu1 %v750_v31  ;;  %s922_s23 = scalar_lea.vmem %s625_s6, 64  ;;  %p927_p7 = scmp.lt.s32.totalorder %s625_s6, %s625_s6 }
  0x7c   :  { %752 = vmatprep.subr.bf16.mxu1 %v988_v0  ;;  %755 = vmatprep.subr.bf16.mxu0 %v988_v0  ;;  %p923_p6 = scmp.ne.s32.totalorder %s625_s6, %s922_s23  ;;  %p928_p8 = scmp.lt.s32.totalorder %s922_s23, %s922_s23 }
  0x7e   :  { %p929_p9 = por %p928_p8, %p927_p7 }
  0x7f   :  { %754 = vmatpush3.bf16.msra.mxu1 %v753_v37 }
  0x80   :  { %p930_p10 = pnand %p929_p9, %p923_p6 }
  0x82   :  { %724 = vmatmul.mubr.msk.f32.vlgmr.msra.gmra.mrb[2].mxu1 %vm222_vm3, %v332_v41 }
 0x147   :  { %v207_v11 = vpop.f32.mrb[0].mxu0 }
 0x148   :  { %v692_v12 = vpop.f32.mrb[1].mxu0  ;;  %v208_v18 = vadd.f32 %v653_v17, %v207_v11 }
 0x14d   :  { %v292_v14 = vpop.f32.mrb[0].mxu1 }
 0x14e   :  { %v293_v15 = vadd.f32 %v656_v13, %v292_v14  ;;  %v703_v16 = vpop.f32.mrb[1].mxu1 }
 0x150   :  { %304 = vrot.lane.b32.xlu0 %v293_v15, %s991_s24  ;;  %v296_v19 = vadd.f32 %v293_v15, %v208_v18 }
 0x152   :  { %v658_v20 = vmul.f32 -1.442695, %v296_v19 }
 0x154   :  { %778 = vpow2.f32 %v658_v20 }
 0x155   :  { %v496_v49 = vpop.f32.mrb[2].mxu1 }
 0x156   :  { %v497_v50 = vadd.f32 %v661_v48, %v496_v49  ;;  %v725_v51 = vpop.f32.mrb[3].mxu1 }
 0x15e   :  { %v779_v21 = vpop.eup %778 }
 0x15f   :  { %v300_v22 = vadd.f32 1.0, %v779_v21 }
 0x161   :  { %780 = vrcp.f32 %v300_v22 }
 0x16b   :  { %v781_v23 = vpop.eup %780 }
 0x16c   :  { %v314_v43 = vsub.f32 1.0, %v781_v23 }
 0x1c2   :  { %v305_v24 = vpop.permute.xlu0 %304 }
 0x1c3   :  { %v307_v25 = vmul.f32 %v781_v23, %v305_v24 }
 0x1c5   :  { %309 = vrot.lane.b32.xlu0 %v307_v25, %s991_s24 }
 0x237   :  { %v310_v26 = vpop.permute.xlu0 %309 }
 0x238   :  { %v312_v27 = vadd.f32 %v310_v26, %v208_v18 }
 0x23a   :  { %782 = vtanh.f32 %v312_v27 }
 0x244   :  { %v783_v39 = vpop.eup %782 }
 0x245   :  { %316 = vrot.lane.b32.xlu1 %v783_v39, %s992_s4 }
 0x249   :  { %320 = vrot.lane.b32.xlu1 %v124_v10, %s979_s18 }
 0x24d   :  { %508 = vrot.lane.b32.xlu1 %v497_v50, %s991_s24 }
 0x2b7   :  { %v317_v42 = vpop.permute.xlu1 %316 }
 0x2b8   :  { %v319_v45 = vmul.f32 %v317_v42, %v314_v43 }
 0x2bb   :  { %v321_v44 = vpop.permute.xlu1 %320 }
 0x2bc   :  { %v323_v46 = vmul.f32 %v781_v23, %v321_v44 }
 0x2be   :  { %v324_v47 = vadd.f32 %v323_v46, %v319_v45 }
 0x2bf   :  { %v509_v61 = vpop.permute.xlu1 %508 }
 0x2c0   :  { %326 = vrot.lane.b32.xlu0 %v324_v47, %s992_s4 }
 0x332   :  { %v327_v52 = vpop.permute.xlu0 %326 }
 0x333   :  { %330 = vst.msk [vmem:[#allocation13] sm:$0x3] %vm329_vm4, %v327_v52  ;;  %713 = vmatmul.mubr.msk.f32.vlgmr.msra.gmra.mrb[2].mxu0 %vm222_vm3, %v327_v52 }
 0x334   :  { %734 = vmatprep.mubr.msk.f32.mxu0 %vm990_vm0, %v989_v1  ;;  %757 = vmatpush3.bf16.msra.mxu0 %v756_v6 }
 0x335   :  { %758 = vmatprep.subr.bf16.mxu0 %v988_v0 }
 0x338   :  { %760 = vmatpush3.bf16.msra.mxu0 %v759_v8 }
 0x406   :  { %v412_v54 = vpop.f32.mrb[2].mxu0 }
 0x407   :  { %v413_v55 = vadd.f32 %v659_v53, %v412_v54  ;;  %v714_v56 = vpop.f32.mrb[3].mxu0 }
 0x409   :  { %v500_v57 = vadd.f32 %v497_v50, %v413_v55 }
 0x40b   :  { %v663_v58 = vmul.f32 -1.442695, %v500_v57 }
 0x40d   :  { %784 = vpow2.f32 %v663_v58 }
 0x417   :  { %v785_v59 = vpop.eup %784 }
 0x418   :  { %v504_v60 = vadd.f32 1.0, %v785_v59 }
 0x41a   :  { %786 = vrcp.f32 %v504_v60 }
 0x424   :  { %v787_v62 = vpop.eup %786 }
 0x425   :  { %v511_v63 = vmul.f32 %v787_v62, %v509_v61  ;;  %v518_v11 = vsub.f32 1.0, %v787_v62 }
 0x427   :  { %513 = vrot.lane.b32.xlu0 %v511_v63, %s991_s24 }
 0x42b   :  { %524 = vrot.lane.b32.xlu0 %v332_v41, %s979_s18 }
 0x499   :  { %v514_v1 = vpop.permute.xlu0 %513 }
 0x49a   :  { %v516_v2 = vadd.f32 %v514_v1, %v413_v55 }
 0x49c   :  { %788 = vtanh.f32 %v516_v2 }
 0x49d   :  { %v525_v10 = vpop.permute.xlu0 %524 }
 0x49e   :  { %v527_v13 = vmul.f32 %v787_v62, %v525_v10 }
 0x4a6   :  { %v789_v9 = vpop.eup %788 }
 0x4a7   :  { %520 = vrot.lane.b32.xlu1 %v789_v9, %s992_s4 }
 0x519   :  { %v521_v12 = vpop.permute.xlu1 %520 }
 0x51a   :  { %v523_v14 = vmul.f32 %v521_v12, %v518_v11 }
 0x51c   :  { %v528_v15 = vadd.f32 %v527_v13, %v523_v14 }
 0x51e   :  { %530 = vrot.lane.b32.xlu1 %v528_v15, %s992_s4 }
 0x590   :  { %v531_v16 = vpop.permute.xlu1 %530 }
 0x591   :  { %534 = vst.msk [vmem:[#allocation13 + $0x2] sm:$0x3] %vm329_vm4, %v531_v16  ;;  %735 = vmatmul.mubr.msk.f32.vlgmr.msra.gmra.mrb[4].mxu0 %vm222_vm3, %v531_v16 }
 0x592   :  { %933 = shalt.err (!%p930_p10)
}
 0x593   :  { %s934_s7 = scalar_lea.hbm %s1250_s12, 64 }
 0x594   :  { %p935_p11 = scmp.ne.s32.totalorder %s1250_s12, %s934_s7  ;;  %p938_p12 = scmp.lt.u32.totalorder %s934_s7, %s1250_s12 }
 0x596   :  { %p940_p13 = pnand %p938_p12, %p935_p11 }
 0x598   :  { %943 = shalt.err (!%p940_p13)
}
 0x599   :  { %630 = dma.vmem_to_hbm [thread:$0]  %s625_s6, 64, %s1250_s12, [#allocation4], %s979_s18, %s979_s18, %s980_s19  }
 0x59a   :  { %v664_v0 = vld [vmem:[%s1249_s11] ss:$0 sm:$0xff]  ;;  %s994_s28 = smov [#allocation14]  }
 0x59b   :  { %s637_s4 = sshll.u32 %s994_s28, 4  ;;  %s638_s4 = int_to_ptr.vmem [resolvable:$true] %s637_s4 }
 0x59c   :  { %s944_s5 = scalar_lea.vmem %s638_s4, 32  ;;  %p949_p1 = scmp.lt.s32.totalorder %s638_s4, %s638_s4 }
 0x59d   :  { %p945_p0 = scmp.ne.s32.totalorder %s638_s4, %s944_s5  ;;  %p950_p2 = scmp.lt.s32.totalorder %s944_s5, %s944_s5 }
 0x59f   :  { %p951_p3 = por %p950_p2, %p949_p1 }
 0x5a1   :  { %p952_p4 = pnand %p951_p3, %p945_p0 }
 0x664   :  { %v614_v17 = vpop.f32.mrb[4].mxu0 }
 0x665   :  { %v615_v18 = vadd.f32 %v664_v0, %v614_v17  ;;  %v736_v19 = vpop.f32.mrb[5].mxu0 }
 0x667   :  { %618 = vst [vmem:[#allocation14] sm:$0x3] %v615_v18 }
 0x668   :  { %955 = shalt.err (!%p952_p4)
}
 0x669   :  { %s956_s18 = scalar_lea.hbm %s1251_s13, 32 }
 0x66a   :  { %p957_p5 = scmp.ne.s32.totalorder %s1251_s13, %s956_s18  ;;  %p960_p6 = scmp.lt.u32.totalorder %s956_s18, %s1251_s13 }
 0x66c   :  { %p962_p7 = pnand %p960_p6, %p957_p5 }
 0x66e   :  { %965 = shalt.err (!%p962_p7)
}
 0x66f   :  { %640 = dma.vmem_to_hbm [thread:$0]  %s638_s4, 32, %s1251_s13, [#allocation15]  }
 0x670   :  { %974 = dma.done.wait [#allocation4], 64  }
 0x671   :  { %975 = vsyncadd [#allocation4], 4294967232 }
 0x672   :  { %976 = dma.done.wait [#allocation15], 32  }
 0x673   :  { %977 = vsyncadd [#allocation15], 4294967264 }
 0x674   :  { %647 = vsyncpa [#allocation3], 1 }
 0x675   :  { %648 = vsyncpa [#allocation6], 1 }
 0x676   :  { %649 = vsyncpa [#allocation9], 1 }
 0x677   :  { %650 = vsyncpa [#allocation12], 1 }
 0x678   :  { %651 = vsyncpa [#allocation4], 1 }
 0x679   :  { %652 = vsyncpa [#allocation15], 1 }

</bundles_post_ra>
